<compile_context>
chip_gen: v6e
topology: v6e:2x2x1
jax: 0.10.0
libtpu: 0.0.40
codegen_flags: <defaults>
</compile_context>

<pallas_src>
import functools

import jax
import jax.numpy as jnp
from jax.experimental import pallas as pl
from jax.experimental.pallas import tpu as pltpu

_MAX_HW_CHUNK = 16384                   # largest single-chunk size on the reduced axis
_FALLBACK_HW_CHUNK = 8192               # 128-multiple chunk when HW has no nice divisor
_TARGET_BLOCK_BYTES = 8 * 1024 * 1024   # per input block (x2-3 with multi-buffering)
_MAX_ROW_TILE = 8192
_SMALL_BLOCK_BYTES = 512 * 1024         # below this, use a 3-deep input pipeline


def _sublane_multiple(dtype) -> int:
    itemsize = jnp.dtype(dtype).itemsize
    return max(8, 32 // max(1, itemsize))     # 8 (4B) / 16 (2B) / 32 (1B)


def _round_up(v: int, m: int) -> int:
    return ((v + m - 1) // m) * m


def _vmem_limit_bytes() -> int:
    """Generation-aware scoped-VMEM limit: ~3/4 of physical, conservative default."""
    phys = 64 * 1024 * 1024  # v7x has the smallest physical VMEM (64 MiB)
    try:
        cap = getattr(pltpu.get_tpu_info(), "vmem_capacity_bytes", None)
        if cap:
            phys = int(cap)
    except Exception:
        pass
    return int(min(96 * 1024 * 1024, (phys * 3) // 4))


def _pick_tiles(nc: int, hw: int, dtype):
    """Choose (row_tile, hw_chunk) from static shapes / dtype."""
    itemsize = jnp.dtype(dtype).itemsize
    sub = _sublane_multiple(dtype)

    # Chunk of the reduced (H*W) axis.
    if hw <= _MAX_HW_CHUNK:
        hw_chunk = hw                       # whole row in one block (fast path)
    else:
        hw_chunk = 0
        start = _MAX_HW_CHUNK - (_MAX_HW_CHUNK % 128)
        for c in range(start, 127, -128):   # prefer an exact 128-multiple divisor
            if hw % c == 0:
                hw_chunk = c
                break
        if hw_chunk == 0:
            # No nice divisor: fixed 128-multiple chunk; the partial last chunk
            # is lane-masked to -inf inside the kernel (never whole-row blocks).
            hw_chunk = _FALLBACK_HW_CHUNK

    # Row tile, VMEM budgeted, sublane-multiple, clamped to the row count.
    rows = _TARGET_BLOCK_BYTES // max(1, hw_chunk * itemsize)
    rows = max(sub, (min(rows, _MAX_ROW_TILE) // sub) * sub)
    nc_rounded = _round_up(nc, sub)
    rows = min(rows, nc_rounded)

    # Megacore (v7x has 2 TCs; the row axis is "parallel"): keep >= 2 row steps
    # whenever NC allows it.  No-op when NC is large (budget already splits it).
    if nc > sub:
        rows = min(rows, max(sub, ((nc - 1) // sub) * sub))

    return rows, hw_chunk


def _lse_single_kernel(x_ref, o_ref):
    """Fast path: whole H*W in one block; no scratch, no rescale."""
    x = x_ref[...].astype(jnp.float32)
    m = jnp.max(x, axis=-1, keepdims=True)
    m_safe = jnp.where(m == -jnp.inf, 0.0, m)
    s = jnp.sum(jnp.exp(x - m_safe), axis=-1, keepdims=True)
    lse = jnp.where(m == jnp.inf, jnp.inf,
                    jnp.where(m == -jnp.inf, -jnp.inf, m + jnp.log(s)))
    o_ref[...] = lse.astype(o_ref.dtype)


def _lse_stream_kernel(x_ref, o_ref, m_ref, s_ref, *, hw, hw_chunk, mask_last):
    """Online (streaming) logsumexp over the last axis.

    Grid: (row tiles ["parallel"], hw chunks ["arbitrary", reduction]).
    x_ref: (ROW_TILE, HW_CHUNK) input block
    o_ref: (ROW_TILE, 1) output block (same block for every hw chunk)
    m_ref/s_ref: (ROW_TILE, 1) f32 running max / rescaled sum in VMEM scratch
    """
    j = pl.program_id(1)

    @pl.when(j == 0)
    def _init():
        m_ref[...] = jnp.full(m_ref.shape, -jnp.inf, jnp.float32)
        s_ref[...] = jnp.zeros(s_ref.shape, jnp.float32)

    x = x_ref[...].astype(jnp.float32)
    if mask_last:
        # HW does not divide hw_chunk: lane-mask the columns past HW to -inf so
        # the partial last chunk's garbage never enters the max / exp-sum.
        col = jax.lax.broadcasted_iota(jnp.int32, x.shape, dimension=1)
        x = jnp.where(j * hw_chunk + col < hw, x, -jnp.inf)

    m_old = m_ref[...]
    m_new = jnp.maximum(m_old, jnp.max(x, axis=-1, keepdims=True))
    # Guard all-(-inf) rows so we never form (-inf) - (-inf) = nan.
    m_safe = jnp.where(m_new == -jnp.inf, 0.0, m_new)
    # Keep the exp in f32 for 1e-5 parity; switch to bf16 only if a v7x bundle
    # dump shows the EUP is the binding slot.
    s_ref[...] = s_ref[...] * jnp.exp(m_old - m_safe) + jnp.sum(
        jnp.exp(x - m_safe), axis=-1, keepdims=True)
    m_ref[...] = m_new

    @pl.when(j == pl.num_programs(1) - 1)
    def _finalize():
        m = m_ref[...]
        s = s_ref[...]
        lse = jnp.where(m == jnp.inf, jnp.inf,
                        jnp.where(m == -jnp.inf, -jnp.inf, m + jnp.log(s)))
        o_ref[...] = lse.astype(o_ref.dtype)


@functools.partial(jax.jit, static_argnames=("keepdim",))
def logsumexp_pool(x, keepdim=False):
    """Equivalent of torch.logsumexp(x, dim=(2, 3), keepdim=keepdim), x in NCHW."""
    N, C, H, W = x.shape
    NC, HW = N * C, H * W
    xf = x.reshape(NC, HW)  # free row-major view, no HBM copy

    row_tile, hw_chunk = _pick_tiles(NC, HW, x.dtype)
    itemsize = jnp.dtype(x.dtype).itemsize

    row_steps = pl.cdiv(NC, row_tile)
    hw_steps = pl.cdiv(HW, hw_chunk)
    block_bytes = row_tile * hw_chunk * itemsize

    # Small blocks leave DMA issue latency exposed -> 3-deep input pipeline.
    spec_kwargs = {}
    if block_bytes < _SMALL_BLOCK_BYTES and row_steps * hw_steps >= 3:
        spec_kwargs["pipeline_mode"] = pl.Buffered(3)

    cost = pl.CostEstimate(
        flops=2 * NC * HW,
        transcendentals=NC * HW,
        bytes_accessed=NC * HW * itemsize + NC * itemsize,
    )

    if hw_chunk == HW:
        # Fast path: one HW chunk, 1-D grid over row tiles, no scratch.
        grid = (row_steps,)
        kernel = _lse_single_kernel
        in_specs = [pl.BlockSpec((row_tile, HW), lambda i: (i, 0), **spec_kwargs)]
        out_specs = pl.BlockSpec((row_tile, 1), lambda i: (i, 0))
        scratch_shapes = []
        dim_sem = ("parallel",)
    else:
        # Streaming path: reduction axis last and "arbitrary".
        grid = (row_steps, hw_steps)
        kernel = functools.partial(
            _lse_stream_kernel, hw=HW, hw_chunk=hw_chunk,
            mask_last=(HW % hw_chunk != 0))
        in_specs = [pl.BlockSpec((row_tile, hw_chunk), lambda i, j: (i, j),
                                 **spec_kwargs)]
        out_specs = pl.BlockSpec((row_tile, 1), lambda i, j: (i, 0))
        scratch_shapes = [
            pltpu.VMEM((row_tile, 1), jnp.float32),  # running max
            pltpu.VMEM((row_tile, 1), jnp.float32),  # running rescaled sum
        ]
        dim_sem = ("parallel", "arbitrary")

    out = pl.pallas_call(
        kernel,
        out_shape=jax.ShapeDtypeStruct((NC, 1), x.dtype),
        grid_spec=pltpu.PrefetchScalarGridSpec(
            num_scalar_prefetch=0,
            grid=grid,
            in_specs=in_specs,
            out_specs=out_specs,
            scratch_shapes=scratch_shapes,
        ),
        compiler_params=pltpu.CompilerParams(
            dimension_semantics=dim_sem,
            vmem_limit_bytes=_vmem_limit_bytes(),
        ),
        cost_estimate=cost,
    )(xf)

    out = out[:, 0].reshape(N, C)
    if keepdim:
        out = out.reshape(N, C, 1, 1)
    return out


if __name__ == "__main__":
    key = jax.random.PRNGKey(0)

    # Module-sized example: N=2, C=4, 16x16 spatial (fast path).
    x = jax.random.normal(key, (2, 4, 16, 16), dtype=jnp.float32)
    y = jax.block_until_ready(logsumexp_pool(x, keepdim=False))
    y_keep = jax.block_until_ready(logsumexp_pool(x, keepdim=True))
    ref = jax.scipy.special.logsumexp(x, axis=(2, 3))
    assert y.shape == (2, 4)
    assert y_keep.shape == (2, 4, 1, 1)
    assert jnp.allclose(y, ref, atol=1e-5, rtol=1e-5)
    assert jnp.allclose(y_keep[..., 0, 0], ref, atol=1e-5, rtol=1e-5)

    # Partial last row-block (NC=15) + odd HW (7x7), an all-(-inf) channel and
    # a +inf element (torch.logsumexp parity: -inf and +inf, never NaN).
    x2 = jax.random.normal(jax.random.PRNGKey(1), (3, 5, 7, 7), dtype=jnp.float32)
    x2 = x2.at[0, 0].set(-jnp.inf)
    x2 = x2.at[1, 2, 3, 3].set(jnp.inf)
    y2 = jax.block_until_ready(logsumexp_pool(x2))
    ref2 = jax.scipy.special.logsumexp(x2, axis=(2, 3))
    assert y2.shape == (3, 5)
    assert bool(jnp.isneginf(y2[0, 0]))
    assert bool(jnp.isposinf(y2[1, 2]))
    finite = jnp.isfinite(ref2)
    assert jnp.allclose(jnp.where(finite, y2, 0.0), jnp.where(finite, ref2, 0.0),
                        atol=1e-5, rtol=1e-5)

    # Streaming path with a lane-masked partial HW chunk: 130*130 = 16900
    # (> 16384, no 128-multiple divisor -> fixed 8192 chunk + masking).
    x3 = jax.random.normal(jax.random.PRNGKey(2), (1, 2, 130, 130), dtype=jnp.float32)
    y3 = jax.block_until_ready(logsumexp_pool(x3))
    ref3 = jax.scipy.special.logsumexp(x3, axis=(2, 3))
    assert y3.shape == (1, 2)
    assert jnp.allclose(y3, ref3, atol=1e-5, rtol=1e-5)

    print("KERNEL_OK")
</pallas_src>

<mosaic_0001>
module attributes {stable_mosaic.version = 11 : i64} {
  func.func @_lse_single_kernel(%arg0: i32, %arg1: memref<8x256xf32, #tpu.memory_space<vmem>>, %arg2: memref<8x1xf32, #tpu.memory_space<vmem>>) attributes {dimension_semantics = [#tpu.dimension_semantics<parallel>], iteration_bounds = array<i64: 1>, scalar_prefetch = 0 : i64, scratch_operands = 0 : i64, tpu.core_type = #tpu.core_type<tc>, window_params = [{transform_indices = @transform_0, window_bounds = array<i64: 8, 256>}, {transform_indices = @transform_1, window_bounds = array<i64: 8, 1>}]} {
    %c0 = arith.constant 0 : index
    %c0_0 = arith.constant 0 : index
    %0 = vector.load %arg1[%c0, %c0_0] : memref<8x256xf32, #tpu.memory_space<vmem>>, vector<8x256xf32>
    %cst = arith.constant dense<0xFF800000> : vector<8xf32>
    %1 = vector.multi_reduction <maximumf>, %0, %cst [1] : vector<8x256xf32> to vector<8xf32>
    %2 = vector.shape_cast %1 : vector<8xf32> to vector<8x1xf32>
    %cst_1 = arith.constant 0xFF800000 : f32
    %3 = vector.broadcast %cst_1 : f32 to vector<8x1xf32>
    %4 = arith.cmpf oeq, %2, %3 : vector<8x1xf32>
    %cst_2 = arith.constant 0.000000e+00 : f32
    %5 = vector.broadcast %cst_2 : f32 to vector<8x1xf32>
    %6 = arith.select %4, %5, %2 : vector<8x1xi1>, vector<8x1xf32>
    %7 = vector.broadcast %6 : vector<8x1xf32> to vector<8x256xf32>
    %8 = arith.subf %0, %7 : vector<8x256xf32>
    %9 = math.exp %8 : vector<8x256xf32>
    %cst_3 = arith.constant dense<0.000000e+00> : vector<8xf32>
    %10 = vector.multi_reduction <add>, %9, %cst_3 [1] : vector<8x256xf32> to vector<8xf32>
    %11 = vector.shape_cast %10 : vector<8xf32> to vector<8x1xf32>
    %cst_4 = arith.constant 0x7F800000 : f32
    %12 = vector.broadcast %cst_4 : f32 to vector<8x1xf32>
    %13 = arith.cmpf oeq, %2, %12 : vector<8x1xf32>
    %cst_5 = arith.constant 0xFF800000 : f32
    %14 = vector.broadcast %cst_5 : f32 to vector<8x1xf32>
    %15 = arith.cmpf oeq, %2, %14 : vector<8x1xf32>
    %16 = math.log %11 : vector<8x1xf32>
    %17 = arith.addf %2, %16 : vector<8x1xf32>
    %cst_6 = arith.constant 0xFF800000 : f32
    %18 = vector.broadcast %cst_6 : f32 to vector<8x1xf32>
    %19 = arith.select %15, %18, %17 : vector<8x1xi1>, vector<8x1xf32>
    %cst_7 = arith.constant 0x7F800000 : f32
    %20 = vector.broadcast %cst_7 : f32 to vector<8x1xf32>
    %21 = arith.select %13, %20, %19 : vector<8x1xi1>, vector<8x1xf32>
    %c0_8 = arith.constant 0 : index
    %c0_9 = arith.constant 0 : index
    %22 = vector.load %arg2[%c0_8, %c0_9] : memref<8x1xf32, #tpu.memory_space<vmem>>, vector<8x1xf32>
    tpu.vector_store %arg2[%c0_8, %c0_9], %21 {strides = array<i32>} : memref<8x1xf32, #tpu.memory_space<vmem>>, vector<8x1xf32>,
    return
  }
  func.func @transform_0(%arg0: i32) -> (i32, i32) {
    %c0_i32 = arith.constant 0 : i32
    %c0_i32_0 = arith.constant 0 : i32
    return %arg0, %c0_i32 : i32, i32
  }
  func.func @transform_1(%arg0: i32) -> (i32, i32) {
    %c0_i32 = arith.constant 0 : i32
    %c0_i32_0 = arith.constant 0 : i32
    return %arg0, %c0_i32 : i32, i32
  }
}

</mosaic_0001>

<bundles_post_ra>
// kernel: squeeze.1
= control target key start
LH: loop header
LB: loop body
LE: loop exit
PB: predicated region body
PF: predicated region fallthrough
CT: control target
= control target key end

     0   :  { %s77_s0 = inlined_call_operand.vmem [shape: f32[8], index: 0, kind: input, shape index: {}]   ;;  %s78_s1 = inlined_call_operand.hbm [shape: f32[2,4], index: 1, kind: output, shape index: {}]  }
   0x1   :  { %v6_v0 = vld [vmem:[%s77_s0] sm:$0x1] }
   0x2   :  { %2 = vsyncpa [#allocation1], 0  ;;  %7 = vst [vmem:[#allocation3] sm:$0x1] %v6_v0  ;;  %vm9_vm0 = vcmask 31744   ;;  %s59_s0 = smov 124  }
   0x3   :  { %s60_s8 = smov [#allocation0]  }
   0x4   :  { %s29_s9 = sshll.u32 %s60_s8, 4  ;;  %s30_s9 = int_to_ptr.vmem [resolvable:$true] %s29_s9 }
   0x5   :  { %s37_s10 = scalar_lea.vmem %s30_s9, 32  ;;  %p42_p1 = scmp.lt.s32.totalorder %s30_s9, %s30_s9 }
   0x6   :  { %p38_p0 = scmp.ne.s32.totalorder %s30_s9, %s37_s10  ;;  %p43_p2 = scmp.lt.s32.totalorder %s37_s10, %s37_s10 }
   0x8   :  { %p44_p3 = por %p43_p2, %p42_p1 }
   0x9   :  { %v11_v1 = vld [vmem:[#allocation3] sm:$0x1]  }
   0xa   :  { %v8_v2 = vld [vmem:[#allocation3] sm:$0x1]   ;;  %12 = vrot.lane.b32.xlu0 %v11_v1, %s59_s0  ;;  %p45_p4 = pnand %p44_p3, %p38_p0 }
   0xb   :  { %10 = vst.msk [vmem:[#allocation2] sm:$0x1] %vm9_vm0, %v8_v2  }
  0x7c   :  { %v13_v3 = vpop.permute.xlu0 %12  }
  0x7d   :  { %16 = vst.msk [vmem:[#allocation2 + $0x1] sm:$0x1] %vm9_vm0, %v13_v3  }
  0x84   :  { %v21_v4 = vld [vmem:[#allocation2] sm:$0x3] }
  0x85   :  { %24 = vst [vmem:[#allocation0] sm:$0x3] %v21_v4 }
  0x86   :  { %48 = shalt.err (!%p45_p4)
}
  0x87   :  { %32 = dma.vmem_to_hbm [thread:$0]  %s30_s9, 32, %s78_s1, [#allocation1]  }
  0x88   :  { %57 = dma.done.wait [#allocation1], 32  }
  0x89   :  { %58 = vsyncadd [#allocation1], 4294967264 }
  0x8a   :  { %34 = vsyncpa [#allocation1], 1 }

// kernel: logsumexp_pool.1
= control target key start
LH: loop header
LB: loop body
LE: loop exit
PB: predicated region body
PF: predicated region fallthrough
CT: control target
= control target key end

     0   :  { %vm30_vm1 = vcmask 7168   ;;  %s63_s0 = inlined_call_operand.vmem [shape: f32[8,256], index: 0, kind: input, shape index: {}]   ;;  %s64_s1 = inlined_call_operand.vmem [shape: f32[8,1], index: 1, kind: output, shape index: {}]  }
   0x1   :  { %v8_v0 = vld [vmem:[%s63_s0] sm:$0xff]  ;;  %v9_v1 = vld [vmem:[%s63_s0 + $0x8] sm:$0xff] }
   0x2   :  { %v10_v2 = vmax.f32 %v8_v0, %v9_v1 }
   0x4   :  { %11 = vmax.xlane.f32.xlu0 %v10_v2 }
  0x8d   :  { %v12_v3 = vpop.xlane.xlu0 %11 }
  0x8e   :  { %vm13_vm0 = vcmp.eq.f32.partialorder %v12_v3, -inf  ;;  %vm24_vm2 = vcmp.eq.f32.partialorder %v12_v3, inf }
  0x8f   :  { %v14_v4 = vsel %vm13_vm0, 0.0, %v12_v3 }
  0x90   :  { %v15_v5 = vsub.f32 %v8_v0, %v14_v4  ;;  %v16_v6 = vsub.f32 %v9_v1, %v14_v4 }
  0x92   :  { %v17_v7 = vmul.f32 1.442695, %v15_v5  ;;  %v19_v8 = vmul.f32 1.442695, %v16_v6 }
  0x94   :  { %36 = vpow2.f32 %v17_v7 }
  0x95   :  { %38 = vpow2.f32 %v19_v8 }
  0xa1   :  { %v37_v9 = vpop.eup %36 }
  0xa2   :  { %v39_v10 = vpop.eup %38 }
  0xa3   :  { %v21_v11 = vadd.f32 %v39_v10, %v37_v9 }
  0xa5   :  { %22 = vadd.xlane.f32.xlu0 %v21_v11 }
 0x12e   :  { %v23_v12 = vpop.xlane.xlu0 %22 }
 0x12f   :  { %40 = vlog2.f32 %v23_v12 }
 0x13c   :  { %v41_v13 = vpop.eup %40 }
 0x13d   :  { %v26_v14 = vmul.f32 0.6931472, %v41_v13 }
 0x13f   :  { %v27_v15 = vadd.f32 %v26_v14, %v12_v3 }
 0x141   :  { %v28_v16 = vsel %vm13_vm0, -inf, %v27_v15 }
 0x142   :  { %v29_v17 = vsel %vm24_vm2, inf, %v28_v16 }
 0x143   :  { %31 = vst.msk [vmem:[%s64_s1] sm:$0xff] %vm30_vm1, %v29_v17 }

</bundles_post_ra>
